<compile_context>
chip_gen: v7x
topology: tpu7x:2x2x1
jax: 0.10.0
libtpu: 0.0.40
codegen_flags: <defaults>
</compile_context>

<pallas_src>
import math
import functools

import jax
import jax.numpy as jnp
from jax import lax
from jax.experimental import pallas as pl
from jax.experimental.pallas import tpu as pltpu


def _pick_tile(seq_len, preferred):
    """Largest 128-multiple divisor of seq_len that is <= preferred; else seq_len."""
    if seq_len >= preferred and seq_len % preferred == 0:
        return preferred
    best = None
    t = 128
    while t <= min(seq_len, preferred):
        if seq_len % t == 0:
            best = t
        t += 128
    return best if best is not None else seq_len


def _vmem_limit_bytes():
    """Per-generation VMEM limit: ~80% of physical capacity (headroom for Mosaic scratch)."""
    try:
        cap = pltpu.get_tpu_info().vmem_capacity_bytes
        return int(cap * 0.8)
    except Exception:
        return None  # use the compiler's default scoped-VMEM limit


def _kv_proj_kernel(x_ref, wk_ref, wv_ref, k_ref, v_ref, *, head_num, head_dim):
    x = x_ref[0]                                                       # (ts, D) bf16
    ts = x.shape[0]
    k = jnp.dot(x, wk_ref[...], preferred_element_type=jnp.float32)   # (ts, D) f32
    v = jnp.dot(x, wv_ref[...], preferred_element_type=jnp.float32)
    # Head-major (H, ts, hd): do the transpose ONCE here instead of per q-tile.
    k_ref[0] = k.reshape(ts, head_num, head_dim).transpose(1, 0, 2).astype(jnp.bfloat16)
    v_ref[0] = v.reshape(ts, head_num, head_dim).transpose(1, 0, 2).astype(jnp.bfloat16)


def _attention_kernel(x_ref, wq_ref, wo_ref, k_ref, v_ref, *rest,
                      head_num, head_dim, scale, causal, exp_dtype):
    if causal:
        (o_ref,) = rest
        mask_ref = None
    else:
        mask_ref, o_ref = rest

    qi = pl.program_id(1)

    x_tile = x_ref[0]                                                  # (tq, D) bf16
    tq = x_tile.shape[0]

    # Q projection; fold 1/sqrt(hd) into the small (tq, D) f32 q, then cast to bf16.
    q = jnp.dot(x_tile, wq_ref[...], preferred_element_type=jnp.float32)
    q = q * scale
    qh = q.reshape(tq, head_num, head_dim).transpose(1, 0, 2).astype(jnp.bfloat16)  # (H,tq,hd)

    kh = k_ref[0]                                                      # (H, S, hd) bf16
    vh = v_ref[0]
    seq_len = kh.shape[1]

    # Scores: one head-batched MXU contraction, K already head-major (no per-step relayout).
    scores = jnp.einsum('hqd,hkd->hqk', qh, kh,
                        preferred_element_type=jnp.float32)            # (H, tq, S) f32

    if causal:
        # Generate the causal mask in-kernel: no (tq, S) mask HBM reads / VMEM buffers.
        row = qi * tq + lax.broadcasted_iota(jnp.int32, (tq, seq_len), 0)
        col = lax.broadcasted_iota(jnp.int32, (tq, seq_len), 1)
        scores = jnp.where((col <= row)[None, :, :], scores, jnp.float32(-1e9))
    else:
        scores = scores + mask_ref[...][None, :, :]

    # f32 softmax over keys (matches F.softmax(scores.float(), -1)), with deferred
    # normalization: divide the small (H, tq, hd) PV result, not the (H, tq, S) probs.
    m = jnp.max(scores, axis=-1, keepdims=True)
    p = jnp.exp((scores - m).astype(exp_dtype))
    row_sum = jnp.sum(p.astype(jnp.float32), axis=-1, keepdims=True)   # (H, tq, 1) f32

    attn = jnp.einsum('hqk,hkd->hqd', p.astype(jnp.bfloat16), vh,
                      preferred_element_type=jnp.float32)              # (H, tq, hd) f32
    attn = attn * pl.reciprocal(row_sum, approx=True)

    concat = attn.astype(jnp.bfloat16).transpose(1, 0, 2).reshape(tq, head_num * head_dim)
    out = jnp.dot(concat, wo_ref[...], preferred_element_type=jnp.float32)  # (tq, D)
    o_ref[0] = out.astype(o_ref.dtype)


def attention_pallas(x, wq, wk, wv, wo, mask=None, *, head_num, causal=False,
                     q_tile=256, exp_dtype=jnp.float32):
    """x: (B,S,D) f32; weights PyTorch layout (out,in); mask: additive (S,S) f32 or None."""
    if mask is None and not causal:
        raise ValueError("provide an additive mask or set causal=True")
    B, S, D = x.shape
    head_dim = D // head_num
    tq = _pick_tile(S, q_tile)
    n_q = S // tq
    use_inkernel_mask = causal and mask is None

    # One-time operand prep: transpose to (in, out) and cast to bf16 for the MXU.
    x_bf = x.astype(jnp.bfloat16)
    wq_t = wq.T.astype(jnp.bfloat16)
    wk_t = wk.T.astype(jnp.bfloat16)
    wv_t = wv.T.astype(jnp.bfloat16)
    wo_t = wo.T.astype(jnp.bfloat16)

    vmem_limit = _vmem_limit_bytes()
    cparams = pltpu.CompilerParams(
        dimension_semantics=("parallel", "parallel"),
        vmem_limit_bytes=vmem_limit,
    )

    def const_spec(shape, single_buffer):
        # Constant-index blocks: single-buffer to halve their VMEM (no pipelining benefit).
        if single_buffer:
            return pl.BlockSpec(shape, lambda b, i: (0,) * len(shape),
                                pipeline_mode=pl.Buffered(1))
        return pl.BlockSpec(shape, lambda b, i: (0,) * len(shape))

    def kv_projection(single_buffer):
        kernel = functools.partial(_kv_proj_kernel, head_num=head_num, head_dim=head_dim)
        return pl.pallas_call(
            kernel,
            out_shape=(jax.ShapeDtypeStruct((B, head_num, S, head_dim), jnp.bfloat16),
                       jax.ShapeDtypeStruct((B, head_num, S, head_dim), jnp.bfloat16)),
            grid_spec=pltpu.PrefetchScalarGridSpec(
                num_scalar_prefetch=0,
                grid=(B, n_q),
                in_specs=[
                    pl.BlockSpec((1, tq, D), lambda b, si: (b, si, 0)),
                    const_spec((D, D), single_buffer),                   # wk^T
                    const_spec((D, D), single_buffer),                   # wv^T
                ],
                out_specs=[
                    pl.BlockSpec((1, head_num, tq, head_dim), lambda b, si: (b, 0, si, 0)),
                    pl.BlockSpec((1, head_num, tq, head_dim), lambda b, si: (b, 0, si, 0)),
                ],
            ),
            compiler_params=cparams,
        )(x_bf, wk_t, wv_t)

    def attention_call(k_bh, v_bh, single_buffer):
        kernel = functools.partial(
            _attention_kernel, head_num=head_num, head_dim=head_dim,
            scale=1.0 / math.sqrt(head_dim), causal=use_inkernel_mask,
            exp_dtype=exp_dtype)
        in_specs = [
            pl.BlockSpec((1, tq, D), lambda b, qi: (b, qi, 0)),          # x q-tile
            const_spec((D, D), single_buffer),                           # wq^T
            const_spec((D, D), single_buffer),                           # wo^T
            pl.BlockSpec((1, head_num, S, head_dim), lambda b, qi: (b, 0, 0, 0)),  # K
            pl.BlockSpec((1, head_num, S, head_dim), lambda b, qi: (b, 0, 0, 0)),  # V
        ]
        args = [x_bf, wq_t, wo_t, k_bh, v_bh]
        if not use_inkernel_mask:
            in_specs.append(pl.BlockSpec((tq, S), lambda b, qi: (qi, 0)))
            args.append(mask.astype(jnp.float32))
        return pl.pallas_call(
            kernel,
            out_shape=jax.ShapeDtypeStruct((B, S, D), x.dtype),
            grid_spec=pltpu.PrefetchScalarGridSpec(
                num_scalar_prefetch=0,
                grid=(B, n_q),
                in_specs=in_specs,
                out_specs=pl.BlockSpec((1, tq, D), lambda b, qi: (b, qi, 0)),
            ),
            compiler_params=cparams,
        )(*args)

    def run(single_buffer):
        k_bh, v_bh = kv_projection(single_buffer)
        return attention_call(k_bh, v_bh, single_buffer)

    try:
        return run(True)
    except Exception:
        # pipeline_mode=pl.Buffered(1) not supported in this JAX build -> default buffering.
        return run(False)


def attention_reference(x, wq, wk, wv, wo, mask, *, head_num):
    """Pure-JAX f32 reference mirroring the PyTorch forward exactly."""
    B, S, D = x.shape
    hd = D // head_num
    xq = x @ wq.T
    xk = x @ wk.T
    xv = x @ wv.T
    q = xq.reshape(B, S, head_num, hd).transpose(0, 2, 1, 3)
    k = xk.reshape(B, S, head_num, hd).transpose(0, 2, 1, 3)
    v = xv.reshape(B, S, head_num, hd).transpose(0, 2, 1, 3)
    scores = jnp.einsum("bhqd,bhkd->bhqk", q, k) / math.sqrt(hd)
    scores = scores + mask  # (S, S) broadcasts over (B, H)
    p = jax.nn.softmax(scores.astype(jnp.float32), axis=-1).astype(q.dtype)
    out = jnp.einsum("bhqk,bhkd->bhqd", p, v)
    out = out.transpose(0, 2, 1, 3).reshape(B, S, D)
    return out @ wo.T


if __name__ == "__main__":
    B, S, D, H = 2, 8, 32, 4   # batch, seq, dim, head_num  (head_dim = 8)

    key = jax.random.PRNGKey(0)
    kx, kq, kk, kv, ko = jax.random.split(key, 5)

    x = jax.random.normal(kx, (B, S, D), dtype=jnp.float32)
    # Deterministic "Linear" weights, PyTorch layout (out_features, in_features).
    wq = jax.random.normal(kq, (D, D), dtype=jnp.float32) * 0.05
    wk = jax.random.normal(kk, (D, D), dtype=jnp.float32) * 0.05
    wv = jax.random.normal(kv, (D, D), dtype=jnp.float32) * 0.05
    wo = jax.random.normal(ko, (D, D), dtype=jnp.float32) * 0.05

    # Causal additive mask (S, S): 0 on/below diagonal, -1e9 above.
    tril = jnp.tril(jnp.ones((S, S), dtype=jnp.float32))
    mask = jnp.where(tril == 1.0, 0.0, -1e9).astype(jnp.float32)

    ref = attention_reference(x, wq, wk, wv, wo, mask, head_num=H)

    # Path 1: explicit additive mask input (matches the module's forward(x, mask)).
    out_masked = jax.block_until_ready(
        attention_pallas(x, wq, wk, wv, wo, mask, head_num=H))
    # Path 2: causal mask generated in-kernel (no mask DMA).
    out_causal = jax.block_until_ready(
        attention_pallas(x, wq, wk, wv, wo, None, head_num=H, causal=True))

    assert out_masked.shape == (B, S, D) and out_causal.shape == (B, S, D)
    # bf16 MXU operands + approx reciprocal => slightly looser tolerance than pure-f32.
    assert jnp.allclose(out_masked, ref, atol=2e-2, rtol=2e-2), "masked path mismatch"
    assert jnp.allclose(out_causal, ref, atol=2e-2, rtol=2e-2), "causal path mismatch"

    print("KERNEL_OK")
</pallas_src>

<mosaic_0001>
module attributes {stable_mosaic.version = 11 : i64} {
  func.func @_kv_proj_kernel(%arg0: i32, %arg1: i32, %arg2: memref<1x8x32xbf16, #tpu.memory_space<vmem>>, %arg3: memref<32x32xbf16, #tpu.memory_space<vmem>>, %arg4: memref<32x32xbf16, #tpu.memory_space<vmem>>, %arg5: memref<1x4x8x8xbf16, #tpu.memory_space<vmem>>, %arg6: memref<1x4x8x8xbf16, #tpu.memory_space<vmem>>) attributes {dimension_semantics = [#tpu.dimension_semantics<parallel>, #tpu.dimension_semantics<parallel>], iteration_bounds = array<i64: 2, 1>, scalar_prefetch = 0 : i64, scratch_operands = 0 : i64, tpu.core_type = #tpu.core_type<tc>, window_params = [{transform_indices = @transform_0, window_bounds = array<i64: 1, 8, 32>}, {pipeline_mode = #tpu.pipeline_mode<synchronous>, transform_indices = @transform_1, window_bounds = array<i64: 32, 32>}, {pipeline_mode = #tpu.pipeline_mode<synchronous>, transform_indices = @transform_2, window_bounds = array<i64: 32, 32>}, {transform_indices = @transform_3, window_bounds = array<i64: 1, 4, 8, 8>}, {transform_indices = @transform_4, window_bounds = array<i64: 1, 4, 8, 8>}]} {
    %c0 = arith.constant 0 : index
    %c0_0 = arith.constant 0 : index
    %c0_1 = arith.constant 0 : index
    %0 = vector.load %arg2[%c0, %c0_0, %c0_1] : memref<1x8x32xbf16, #tpu.memory_space<vmem>>, vector<1x8x32xbf16>
    %1 = vector.shape_cast %0 : vector<1x8x32xbf16> to vector<8x32xbf16>
    %c0_2 = arith.constant 0 : index
    %c0_3 = arith.constant 0 : index
    %2 = vector.load %arg3[%c0_2, %c0_3] : memref<32x32xbf16, #tpu.memory_space<vmem>>, vector<32x32xbf16>
    %cst = arith.constant dense<0.000000e+00> : vector<8x32xf32>
    %3 = tpu.matmul %1, %2, %cst {dimension_numbers = #tpu.dot_dimension_numbers<[1], [0], [0], [1], [0, 0, 1, 1], [], []>} : vector<8x32xbf16>, vector<32x32xbf16>, vector<8x32xf32> -> vector<8x32xf32>
    %c0_4 = arith.constant 0 : index
    %c0_5 = arith.constant 0 : index
    %4 = vector.load %arg4[%c0_4, %c0_5] : memref<32x32xbf16, #tpu.memory_space<vmem>>, vector<32x32xbf16>
    %cst_6 = arith.constant dense<0.000000e+00> : vector<8x32xf32>
    %5 = tpu.matmul %1, %4, %cst_6 {dimension_numbers = #tpu.dot_dimension_numbers<[1], [0], [0], [1], [0, 0, 1, 1], [], []>} : vector<8x32xbf16>, vector<32x32xbf16>, vector<8x32xf32> -> vector<8x32xf32>
    %6 = vector.shape_cast %3 : vector<8x32xf32> to vector<8x4x8xf32>
    %7 = tpu.transpose %6, [1, 0, 2] : vector<8x4x8xf32> -> vector<4x8x8xf32>
    %8 = arith.truncf %7 : vector<4x8x8xf32> to vector<4x8x8xbf16>
    %c0_7 = arith.constant 0 : index
    %c0_8 = arith.constant 0 : index
    %c0_9 = arith.constant 0 : index
    %c0_10 = arith.constant 0 : index
    %9 = vector.load %arg5[%c0_7, %c0_8, %c0_9, %c0_10] : memref<1x4x8x8xbf16, #tpu.memory_space<vmem>>, vector<1x4x8x8xbf16>
    %10 = vector.shape_cast %9 : vector<1x4x8x8xbf16> to vector<4x8x8xbf16>
    %11 = vector.shape_cast %8 : vector<4x8x8xbf16> to vector<1x4x8x8xbf16>
    tpu.vector_store %arg5[%c0_7, %c0_8, %c0_9, %c0_10], %11 {strides = array<i32>} : memref<1x4x8x8xbf16, #tpu.memory_space<vmem>>, vector<1x4x8x8xbf16>,
    %12 = vector.shape_cast %5 : vector<8x32xf32> to vector<8x4x8xf32>
    %13 = tpu.transpose %12, [1, 0, 2] : vector<8x4x8xf32> -> vector<4x8x8xf32>
    %14 = arith.truncf %13 : vector<4x8x8xf32> to vector<4x8x8xbf16>
    %c0_11 = arith.constant 0 : index
    %c0_12 = arith.constant 0 : index
    %c0_13 = arith.constant 0 : index
    %c0_14 = arith.constant 0 : index
    %15 = vector.load %arg6[%c0_11, %c0_12, %c0_13, %c0_14] : memref<1x4x8x8xbf16, #tpu.memory_space<vmem>>, vector<1x4x8x8xbf16>
    %16 = vector.shape_cast %15 : vector<1x4x8x8xbf16> to vector<4x8x8xbf16>
    %17 = vector.shape_cast %14 : vector<4x8x8xbf16> to vector<1x4x8x8xbf16>
    tpu.vector_store %arg6[%c0_11, %c0_12, %c0_13, %c0_14], %17 {strides = array<i32>} : memref<1x4x8x8xbf16, #tpu.memory_space<vmem>>, vector<1x4x8x8xbf16>,
    return
  }
  func.func @transform_0(%arg0: i32, %arg1: i32) -> (i32, i32, i32) {
    %c0_i32 = arith.constant 0 : i32
    %c0_i32_0 = arith.constant 0 : i32
    return %arg0, %arg1, %c0_i32 : i32, i32, i32
  }
  func.func @transform_1(%arg0: i32, %arg1: i32) -> (i32, i32) {
    %c0_i32 = arith.constant 0 : i32
    %c0_i32_0 = arith.constant 0 : i32
    %c0_i32_1 = arith.constant 0 : i32
    return %c0_i32, %c0_i32_0 : i32, i32
  }
  func.func @transform_2(%arg0: i32, %arg1: i32) -> (i32, i32) {
    %c0_i32 = arith.constant 0 : i32
    %c0_i32_0 = arith.constant 0 : i32
    %c0_i32_1 = arith.constant 0 : i32
    return %c0_i32, %c0_i32_0 : i32, i32
  }
  func.func @transform_3(%arg0: i32, %arg1: i32) -> (i32, i32, i32, i32) {
    %c0_i32 = arith.constant 0 : i32
    %c0_i32_0 = arith.constant 0 : i32
    %c0_i32_1 = arith.constant 0 : i32
    return %arg0, %c0_i32, %arg1, %c0_i32_0 : i32, i32, i32, i32
  }
  func.func @transform_4(%arg0: i32, %arg1: i32) -> (i32, i32, i32, i32) {
    %c0_i32 = arith.constant 0 : i32
    %c0_i32_0 = arith.constant 0 : i32
    %c0_i32_1 = arith.constant 0 : i32
    return %arg0, %c0_i32, %arg1, %c0_i32_0 : i32, i32, i32, i32
  }
}

module attributes {stable_mosaic.version = 11 : i64} {
  func.func @_kv_proj_kernel(%arg0: i32, %arg1: i32, %arg2: memref<1x8x32xbf16, #tpu.memory_space<vmem>>, %arg3: memref<32x32xbf16, #tpu.memory_space<vmem>>, %arg4: memref<32x32xbf16, #tpu.memory_space<vmem>>, %arg5: memref<1x4x8x8xbf16, #tpu.memory_space<vmem>>, %arg6: memref<1x4x8x8xbf16, #tpu.memory_space<vmem>>) attributes {dimension_semantics = [#tpu.dimension_semantics<parallel>, #tpu.dimension_semantics<parallel>], iteration_bounds = array<i64: 2, 1>, scalar_prefetch = 0 : i64, scratch_operands = 0 : i64, tpu.core_type = #tpu.core_type<tc>, window_params = [{transform_indices = @transform_0, window_bounds = array<i64: 1, 8, 32>}, {pipeline_mode = #tpu.pipeline_mode<synchronous>, transform_indices = @transform_1, window_bounds = array<i64: 32, 32>}, {pipeline_mode = #tpu.pipeline_mode<synchronous>, transform_indices = @transform_2, window_bounds = array<i64: 32, 32>}, {transform_indices = @transform_3, window_bounds = array<i64: 1, 4, 8, 8>}, {transform_indices = @transform_4, window_bounds = array<i64: 1, 4, 8, 8>}]} {
    %c0 = arith.constant 0 : index
    %c0_0 = arith.constant 0 : index
    %c0_1 = arith.constant 0 : index
    %0 = vector.load %arg2[%c0, %c0_0, %c0_1] : memref<1x8x32xbf16, #tpu.memory_space<vmem>>, vector<1x8x32xbf16>
    %1 = vector.shape_cast %0 : vector<1x8x32xbf16> to vector<8x32xbf16>
    %c0_2 = arith.constant 0 : index
    %c0_3 = arith.constant 0 : index
    %2 = vector.load %arg3[%c0_2, %c0_3] : memref<32x32xbf16, #tpu.memory_space<vmem>>, vector<32x32xbf16>
    %cst = arith.constant dense<0.000000e+00> : vector<8x32xf32>
    %3 = tpu.matmul %1, %2, %cst {dimension_numbers = #tpu.dot_dimension_numbers<[1], [0], [0], [1], [0, 0, 1, 1], [], []>} : vector<8x32xbf16>, vector<32x32xbf16>, vector<8x32xf32> -> vector<8x32xf32>
    %c0_4 = arith.constant 0 : index
    %c0_5 = arith.constant 0 : index
    %4 = vector.load %arg4[%c0_4, %c0_5] : memref<32x32xbf16, #tpu.memory_space<vmem>>, vector<32x32xbf16>
    %cst_6 = arith.constant dense<0.000000e+00> : vector<8x32xf32>
    %5 = tpu.matmul %1, %4, %cst_6 {dimension_numbers = #tpu.dot_dimension_numbers<[1], [0], [0], [1], [0, 0, 1, 1], [], []>} : vector<8x32xbf16>, vector<32x32xbf16>, vector<8x32xf32> -> vector<8x32xf32>
    %6 = vector.shape_cast %3 : vector<8x32xf32> to vector<8x4x8xf32>
    %7 = tpu.transpose %6, [1, 0, 2] : vector<8x4x8xf32> -> vector<4x8x8xf32>
    %8 = arith.truncf %7 : vector<4x8x8xf32> to vector<4x8x8xbf16>
    %c0_7 = arith.constant 0 : index
    %c0_8 = arith.constant 0 : index
    %c0_9 = arith.constant 0 : index
    %c0_10 = arith.constant 0 : index
    %9 = vector.load %arg5[%c0_7, %c0_8, %c0_9, %c0_10] : memref<1x4x8x8xbf16, #tpu.memory_space<vmem>>, vector<1x4x8x8xbf16>
    %10 = vector.shape_cast %9 : vector<1x4x8x8xbf16> to vector<4x8x8xbf16>
    %11 = vector.shape_cast %8 : vector<4x8x8xbf16> to vector<1x4x8x8xbf16>
    tpu.vector_store %arg5[%c0_7, %c0_8, %c0_9, %c0_10], %11 {strides = array<i32>} : memref<1x4x8x8xbf16, #tpu.memory_space<vmem>>, vector<1x4x8x8xbf16>,
    %12 = vector.shape_cast %5 : vector<8x32xf32> to vector<8x4x8xf32>
    %13 = tpu.transpose %12, [1, 0, 2] : vector<8x4x8xf32> -> vector<4x8x8xf32>
    %14 = arith.truncf %13 : vector<4x8x8xf32> to vector<4x8x8xbf16>
    %c0_11 = arith.constant 0 : index
    %c0_12 = arith.constant 0 : index
    %c0_13 = arith.constant 0 : index
    %c0_14 = arith.constant 0 : index
    %15 = vector.load %arg6[%c0_11, %c0_12, %c0_13, %c0_14] : memref<1x4x8x8xbf16, #tpu.memory_space<vmem>>, vector<1x4x8x8xbf16>
    %16 = vector.shape_cast %15 : vector<1x4x8x8xbf16> to vector<4x8x8xbf16>
    %17 = vector.shape_cast %14 : vector<4x8x8xbf16> to vector<1x4x8x8xbf16>
    tpu.vector_store %arg6[%c0_11, %c0_12, %c0_13, %c0_14], %17 {strides = array<i32>} : memref<1x4x8x8xbf16, #tpu.memory_space<vmem>>, vector<1x4x8x8xbf16>,
    return
  }
  func.func @transform_0(%arg0: i32, %arg1: i32) -> (i32, i32, i32) {
    %c0_i32 = arith.constant 0 : i32
    %c0_i32_0 = arith.constant 0 : i32
    return %arg0, %arg1, %c0_i32 : i32, i32, i32
  }
  func.func @transform_1(%arg0: i32, %arg1: i32) -> (i32, i32) {
    %c0_i32 = arith.constant 0 : i32
    %c0_i32_0 = arith.constant 0 : i32
    %c0_i32_1 = arith.constant 0 : i32
    return %c0_i32, %c0_i32_0 : i32, i32
  }
  func.func @transform_2(%arg0: i32, %arg1: i32) -> (i32, i32) {
    %c0_i32 = arith.constant 0 : i32
    %c0_i32_0 = arith.constant 0 : i32
    %c0_i32_1 = arith.constant 0 : i32
    return %c0_i32, %c0_i32_0 : i32, i32
  }
  func.func @transform_3(%arg0: i32, %arg1: i32) -> (i32, i32, i32, i32) {
    %c0_i32 = arith.constant 0 : i32
    %c0_i32_0 = arith.constant 0 : i32
    %c0_i32_1 = arith.constant 0 : i32
    return %arg0, %c0_i32, %arg1, %c0_i32_0 : i32, i32, i32, i32
  }
  func.func @transform_4(%arg0: i32, %arg1: i32) -> (i32, i32, i32, i32) {
    %c0_i32 = arith.constant 0 : i32
    %c0_i32_0 = arith.constant 0 : i32
    %c0_i32_1 = arith.constant 0 : i32
    return %arg0, %c0_i32, %arg1, %c0_i32_0 : i32, i32, i32, i32
  }
}

</mosaic_0001>

<bundles_post_ra>
// kernel: tpu_custom_call.1
= control target key start
LH: loop header
LB: loop body
LE: loop exit
PB: predicated region body
PF: predicated region fallthrough
CT: control target
= control target key end

     0   :  { %10 = vsyncpa [#allocation3], 0  ;;  %s1630_s0 = inlined_call_operand.hbm [shape: bf16[2,8,32], index: 0, kind: input, shape index: {}]   ;;  %s1631_s1 = inlined_call_operand.hbm [shape: bf16[32,32], index: 1, kind: input, shape index: {}]   ;;  %s1632_s2 = inlined_call_operand.hbm [shape: bf16[32,32], index: 2, kind: input, shape index: {}]   ;;  %s1633_s3 = inlined_call_operand.hbm [shape: bf16[2,4,8,8], index: 3, kind: output, shape index: {0}]   ;;  %s1634_s4 = inlined_call_operand.hbm [shape: bf16[2,4,8,8], index: 4, kind: output, shape index: {1}]  }
   0x1   :  { %12 = vsyncpa [#allocation3 + $0x1], 0 }
   0x2   :  { %13 = vsyncpa [#allocation6], 0 }
   0x3   :  { %14 = vsyncpa [#allocation4], 0 }
   0x4   :  { %16 = vsyncpa [#allocation4 + $0x1], 0 }
   0x5   :  { %17 = vsyncpa [#allocation10], 0 }
   0x6   :  { %19 = vsyncpa [#allocation10 + $0x1], 0  ;;  %s1279_s15 = smov 0   ;;  %s1281_s16 = smov 0  }
   0x7   :  { %s1283_s17 = smov 0   ;;  %s1285_s18 = smov 0  }
   0x8   :  { %s1287_s19 = smov 0   ;;  %s1289_s20 = smov 0  }
   0x9 LB: > { %s873_s21 = sadd.s32 4294967295, %s1236_s20   ;;  %s874_s22 = sadd.s32 4294967294, %s1236_s20   ;;  %s1236_s20 = sphi %s1289_s20, %s25_s20   ;;  %s1232_s19 = sphi %s1287_s19, %s1656_s19   ;;  %s1228_s18 = sphi %s1285_s18, %s1655_s18   ;;  %s1224_s17 = sphi %s1283_s17, %s1654_s17   ;;  %s1220_s16 = sphi %s1281_s16, %s1653_s16   ;;  %s1216_s15 = sphi %s1279_s15, %s1652_s15  }
   0xa   : > { %p59_p0 = scmp.ne.s32.totalorder %s1220_s16, %s1216_s15  ;;  %p1313_p1 = scmp.eq.s32.totalorder %s873_s21, 0 }
   0xb   : > { %p1317_p2 = scmp.eq.s32.totalorder %s873_s21, 1  ;;  %p133_p3 = scmp.eq.s32.totalorder %s874_s22, 1 }
   0xc   : > { %s1639_s23 = scalar_select %p1313_p1, 1, 0 }
   0xd   : > { %p1323_p4 = por %p1313_p1, %p59_p0  ;;  %p875_p5 = scmp.ge.s32.totalorder %s1236_s20, 1 }
   0xe   : > { %p1328_p6 = por %p133_p3, %p59_p0  ;;  %p168_p7 = scmp.lt.s32.totalorder %s1236_s20, 3 }
   0xf   : > { %s1641_s25 = scalar_select %p1323_p4, 1, 0 }
  0x10   : > { %s1642_s26 = scalar_select %p1328_p6, 1, 0 }
  0x11   : > { %p1333_p8 = pnand %p875_p5, %p168_p7  ;;  %s1238_s28 = smov [#allocation5]  }
  0x12   : > { %s180_s29 = sshll.u32 %s1238_s28, 4  ;;  %s1239_s5 = smov [#allocation7]   ;;  %s1337_s29 = int_to_ptr.vmem [resolvable:$true] %s180_s29 }
  0x13   : > { %p943_p9 = pneg %p1333_p8  ;;  %s193_s6 = sshll.u32 %s1239_s5, 4  ;;  %s1348_s6 = int_to_ptr.vmem [resolvable:$true] %s193_s6 }
  0x14   : > { %s1032_s9 = scalar_lea.hbm %s1631_s1, 256 }
  0x15   : > { %p1344_p11 = pnand %p943_p9, %p1313_p1  ;;  %p1033_p12 = scmp.ne.s32.totalorder %s1631_s1, %s1032_s9 }
  0x16   : > { %p1039_p5 = scmp.lt.u32.totalorder %s1032_s9, %s1631_s1 }
  0x17   : > { %p1034_p13 = pneg %p1344_p11 }
  0x19   : > { %p1035_p0 = pnand %p1034_p13, %p1033_p12 }
  0x1b   : > { %p1036_p3 = pneg %p1035_p0 }
  0x1d   : > { %p1041_p7 = pnand %p1039_p5, %p1036_p3 }
  0x1f   : > { %1044 = shalt.err (!%p1041_p7)
}
  0x20   : > { %s1045_s14 = scalar_lea.vmem %s1337_s29, 256  ;;  %p1053_p1 = scmp.lt.s32.totalorder %s1337_s29, %s1337_s29 }
  0x21   : > { %p1046_p9 = scmp.ne.s32.totalorder %s1337_s29, %s1045_s14  ;;  %p1054_p12 = scmp.lt.s32.totalorder %s1045_s14, %s1045_s14 }
  0x23   : > { %p1048_p10 = pnand %p1046_p9, %p1034_p13  ;;  %p1055_p0 = por %p1054_p12, %p1053_p1 }
  0x25   : > { %p1049_p6 = pneg %p1048_p10 }
  0x27   : > { %p1056_p4 = pnand %p1055_p0, %p1049_p6 }
  0x29   : > { %1059 = shalt.err (!%p1056_p4)
}
  0x2a   : > { %s1240_s21 = smov 64   ;;  %s1241_s22 = smov 4  }
  0x2b   : > { %946 = dma.hbm_to_vmem [thread:$0]  (!%p1344_p11), %s1631_s1, 256, %s1337_s29, [#allocation6], %s1240_s21, %s1240_s21, %s1241_s22  }
  0x2c   : > { %s1060_s9 = scalar_lea.hbm %s1632_s2, 256 }
  0x2d   : > { %p1061_p1 = scmp.ne.s32.totalorder %s1632_s2, %s1060_s9  ;;  %p1067_p10 = scmp.lt.u32.totalorder %s1060_s9, %s1632_s2 }
  0x2f   : > { %p1063_p4 = pnand %p1061_p1, %p1034_p13 }
  0x31   : > { %p1064_p6 = pneg %p1063_p4 }
  0x33   : > { %p1069_p3 = pnand %p1067_p10, %p1064_p6 }
  0x35   : > { %1072 = shalt.err (!%p1069_p3)
}
  0x36   : > { %s1073_s29 = scalar_lea.vmem %s1348_s6, 256  ;;  %p1081_p12 = scmp.lt.s32.totalorder %s1348_s6, %s1348_s6 }
  0x37   : > { %p1074_p5 = scmp.ne.s32.totalorder %s1348_s6, %s1073_s29  ;;  %p1082_p0 = scmp.lt.s32.totalorder %s1073_s29, %s1073_s29 }
  0x39   : > { %p1076_p7 = pnand %p1074_p5, %p1034_p13  ;;  %p1083_p1 = por %p1082_p0, %p1081_p12 }
  0x3b   : > { %p1077_p9 = pneg %p1076_p7 }
  0x3d   : > { %p1084_p4 = pnand %p1083_p1, %p1077_p9 }
  0x3f   : > { %1087 = shalt.err (!%p1084_p4)
}
  0x40   : > { %949 = dma.hbm_to_vmem [thread:$0]  (!%p1344_p11), %s1632_s2, 256, %s1348_s6, [#allocation6], %s1240_s21, %s1240_s21, %s1241_s22  }
  0x41   : > { %s37_s5 = sadd.s32 1, %s1232_s19  ;;  %s46_s7 = sadd.s32 1, %s1224_s17 }
  0x42   : > { %p39_p13 = scmp.ge.s32.totalorder %s37_s5, 2  ;;  %p53_p6 = scmp.ne.s32.totalorder %s1224_s17, %s1220_s16 }
  0x43   : > { %p54_p10 = scmp.eq.s32.totalorder %s1236_s20, 0  ;;  %p963_p3 = scmp.lt.s32.totalorder %s1236_s20, 2 }
  0x44   : > { %s1658_s5 = smov (%p39_p13, %s37_s5), 0  ;;  %p1412_p7 = por %p1317_p2, %p53_p6 }
  0x45   : > { %p55_p5 = por %p54_p10, %p53_p6  ;;  %s41_s8 = ssub.s32 %s1232_s19, %s1658_s5 }
  0x46   : > { %s1645_s30 = scalar_select %p1412_p7, 1, 0 }
  0x47   : > { %s207_s9 = sand.u32 1, %s1224_s17   ;;  %p44_p9 = scmp.eq.s32.totalorder %s41_s8, 0 }
  0x48   : > { %s879_s6 = sshll.u32 %s207_s9, 2  ;;  %s880_s21 = sshll.u32 %s1232_s19, 6 }
  0x49   : > { %s1421_s22 = scalar_select %p44_p9, %s1224_s17, %s46_s7  }
  0x4a   : > { %s1426_s12 = scalar_lea.hbm %s1630_s0, %s880_s21  ;;  %s211_s24 = scalar_lea.vmem [#allocation2], %s879_s6 }
  0x4b   : > { %s219_s13 = sshll.u32 %s211_s24, 4  ;;  %p1430_p2 = pnand %p963_p3, %p55_p5  ;;  %s1434_s13 = int_to_ptr.vmem [resolvable:$true] %s219_s13 }
  0x4c   : > { %s208_s14 = scalar_lea.sflag [#allocation3], %s207_s9  ;;  %s1088_s28 = scalar_lea.hbm %s1426_s12, 64 }
  0x4d   : > { %p1089_p11 = scmp.ne.s32.totalorder %s1426_s12, %s1088_s28  ;;  %p1090_p12 = pneg %p1430_p2 }
  0x4e   : > { %s1093_s6 = scalar_lea.hbm %s1630_s0, 128  ;;  %p1094_p4 = scmp.lt.u32.totalorder %s1426_s12, %s1630_s0 }
  0x4f   : > { %p1091_p0 = pnand %p1090_p12, %p1089_p11  ;;  %p1095_p13 = scmp.lt.u32.totalorder %s1093_s6, %s1088_s28 }
  0x50   : > { %p1097_p10 = scmp.lt.u32.totalorder %s1088_s28, %s1426_s12 }
  0x51   : > { %p1092_p1 = pneg %p1091_p0  ;;  %p1096_p6 = por %p1095_p13, %p1094_p4 }
  0x53   : > { %p1098_p3 = por %p1097_p10, %p1096_p6 }
  0x55   : > { %p1099_p5 = pnand %p1098_p3, %p1092_p1 }
  0x57   : > { %1102 = shalt.err (!%p1099_p5)
}
  0x58   : > { %s1103_s9 = scalar_lea.vmem %s1434_s13, 64  ;;  %s1242_s11 = smov [#allocation2]  }
  0x59   : > { %p1104_p9 = scmp.ne.s32.totalorder %s1434_s13, %s1103_s9  ;;  %s1108_s24 = sshll.u32 %s1242_s11, 4  ;;  %s1109_s24 = int_to_ptr.vmem [resolvable:$false] %s1108_s24 }
  0x5a   : > { %s1110_s7 = scalar_lea.vmem %s1109_s24, 128  ;;  %p1111_p7 = scmp.lt.s32.totalorder %s1434_s13, %s1109_s24 }
  0x5b   : > { %p1106_p11 = pnand %p1104_p9, %p1090_p12  ;;  %p1112_p4 = scmp.lt.s32.totalorder %s1110_s7, %s1103_s9 }
  0x5d   : > { %p1107_p0 = pneg %p1106_p11  ;;  %p1113_p13 = por %p1112_p4, %p1111_p7 }
  0x5f   : > { %p1114_p6 = pnand %p1113_p13, %p1107_p0 }
  0x61   : > { %1117 = shalt.err (!%p1114_p6)
}
  0x62   : > { %953 = dma.hbm_to_vmem [thread:$0]  (!%p1430_p2), %s1426_s12, 64, %s1434_s13, %s208_s14  }
  0x63   : > { %228 = sbr.rel (%p1333_p8) target bundleno = 511 (0x1ff), region = 32  ;;  %s1464_s28 = sand.u32 (!%p1333_p8), 1, %s1220_s16  }
  0x64   : > { %s882_s8 = sshll.u32 (!%p1333_p8), %s1464_s28, 2  ;;  %s231_s6 = scalar_lea.sflag (!%p1333_p8), [#allocation3], %s1464_s28 }
  0x65   : > { %s234_s21 = scalar_lea.vmem (!%p1333_p8), [#allocation2], %s882_s8  ;;  %p1647_p7 = scmp.ne.s32.totalorder (!%p1333_p8), %s1641_s25, 0 }
  0x6a   : > { %1199 = dma.done.wait (%p1647_p7), %s231_s6, 64  }
  0x6b   : > { %1201 = vsyncadd (%p1647_p7), %s231_s6, 4294967232  ;;  %p1648_p12 = scmp.ne.s32.totalorder %s1639_s23, 0 }
  0x6d   : > { %1203 = dma.done.wait (%p1648_p12), [#allocation6], 512  }
  0x6e   : > { %1205 = vsyncadd (%p1648_p12), [#allocation6], 4294966784  ;;  %v1243_v0 = vmov 0.0   ;;  %vm1244_vm0 = vmmov 0   ;;  %v1028_v1 = vld [vmem:[#allocation5] sm:$0xff]   ;;  %v1029_v2 = vld [vmem:[#allocation7] sm:$0xff]   ;;  %v405_v16 = vlaneseq }
  0x6f   : > { %913 = vmatprep.subr.bf16.mxu0 %v1243_v0  ;;  %921 = vmatprep.subr.bf16.mxu1 %v1243_v0  ;;  %v1030_v3 = vld [vmem:[#allocation5 + $0x8] sm:$0xff]   ;;  %v1031_v4 = vld [vmem:[#allocation7 + $0x8] sm:$0xff]   ;;  %vm290_vm1 = vcmask 261120   ;;  %s1245_s23 = smov 104   ;;  %s1246_s25 = smov 120   ;;  %vm540_vm2 = vcmask 60416  }
  0x70   : > { %917 = vmatprep.mubr.msk.bf16.mxu0 %vm1244_vm0, %v1243_v0  ;;  %925 = vmatprep.mubr.msk.bf16.mxu1 %vm1244_vm0, %v1243_v0  ;;  %v273_v5 = vld [vmem:[%s234_s21] sm:$0xf]  ;;  %s1247_s27 = smov 112   ;;  %v1248_v14 = vmov 1983009808   ;;  %v406_v20 = vshrl.u32 %v405_v16, 7 }
  0x71   : > { %914 = vmatpush3.bf16.msra.mxu0 %v1028_v1  ;;  %922 = vmatpush3.bf16.msra.mxu1 %v1029_v2  ;;  %v403_v15 = vunpack.c.l.s4 %v1248_v14  ;;  %v1249_v17 = vmov 1934713408   ;;  %s885_s12 = sshll.u32 %s1464_s28, 4  ;;  %s905_s13 = sshll.u32 %s1228_s18, 8 }
  0x72   : > { %915 = vmatprep.subr.bf16.mxu0 %v1243_v0  ;;  %923 = vmatprep.subr.bf16.mxu1 %v1243_v0  ;;  %v435_v18 = vunpack.c.l.s4 %v1249_v17  ;;  %s264_s29 = scalar_lea.vmem [#allocation8], %s885_s12  ;;  %s1517_s11 = scalar_lea.hbm %s1633_s3, %s905_s13 }
  0x73   : > { %v404_v19 = vunpack.c.0.s8 %v403_v15  ;;  %s719_s14 = sshll.u32 %s264_s29, 4  ;;  %s1531_s24 = scalar_lea.vmem [#allocation9], %s885_s12  ;;  %s1519_s14 = int_to_ptr.vmem [resolvable:$true] %s719_s14 }
  0x74   : > { %v436_v23 = vunpack.c.0.s8 %v435_v18  ;;  %s736_s7 = sshll.u32 %s1531_s24, 4  ;;  %s700_s8 = scalar_lea.sflag [#allocation4], %s1464_s28  ;;  %s1570_s7 = int_to_ptr.vmem [resolvable:$true] %s736_s7 }
  0x75   : > { %916 = vmatpush3.bf16.msra.mxu0 %v1030_v3  ;;  %924 = vmatpush3.bf16.msra.mxu1 %v1031_v4  ;;  %v1476_v24 = vsub.s32 %v404_v19, %v406_v20  ;;  %s1118_s6 = scalar_lea.vmem %s1519_s14, 256  ;;  %p1649_p2 = scmp.ne.s32.totalorder %s1645_s30, 0 }
  0x76   : > { %v1478_v31 = vsub.s32 %v436_v23, %v406_v20  ;;  %p1119_p8 = scmp.ne.s32.totalorder %s1519_s14, %s1118_s6  ;;  %s1250_s21 = smov [#allocation8]  }
  0x78   : > { %918 = vmatmul.mubr.msk.bf16.vlgmr.msra.gmra.mrb[0].mxu0 %vm290_vm1, %v273_v5  ;;  %926 = vmatmul.mubr.msk.bf16.vlgmr.msra.gmra.mrb[0].mxu1 %vm290_vm1, %v273_v5  ;;  %p1120_p1 = pnand %p1119_p8, %p1649_p2 }
  0x7a   : > { %p1121_p10 = pneg %p1120_p1 }
 0x14b   : > { %v328_v6 = vpop.f32.mrb[0].mxu0  ;;  %v384_v7 = vpop.f32.mrb[0].mxu1 }
 0x14c   : > { %397 = vrot.lane.b32.xlu1 %v328_v6, %s1245_s23  ;;  %391 = vrot.lane.b32.xlu0 %v328_v6, %s1246_s25  ;;  %v919_v8 = vpop.f32.mrb[1].mxu0  ;;  %v927_v10 = vpop.f32.mrb[1].mxu1 }
 0x14d   : > { %v331_v9 = vpop.f32.mrb[2].mxu0  ;;  %v387_v12 = vpop.f32.mrb[2].mxu1 }
 0x14e   : > { %v920_v11 = vpop.f32.mrb[3].mxu0  ;;  %v928_v13 = vpop.f32.mrb[3].mxu1 }
 0x150   : > { %546 = vrot.lane.b32.xlu1 %v384_v7, %s1246_s25  ;;  %394 = vrot.lane.b32.xlu0 %v328_v6, %s1247_s27 }
 0x154   : > { %552 = vrot.lane.b32.xlu1 %v384_v7, %s1245_s23  ;;  %549 = vrot.lane.b32.xlu0 %v384_v7, %s1247_s27  ;;  %s1122_s23 = sshll.u32 %s1250_s21, 4  ;;  %s1123_s23 = int_to_ptr.vmem [resolvable:$false] %s1122_s23 }
 0x155   : > { %s1124_s25 = scalar_lea.vmem %s1123_s23, 512  ;;  %p1125_p3 = scmp.lt.s32.totalorder %s1519_s14, %s1123_s23 }
 0x156   : > { %p1126_p5 = scmp.lt.s32.totalorder %s1124_s25, %s1118_s6 }
 0x158   : > { %p1127_p9 = por %p1126_p5, %p1125_p3 }
 0x15a   : > { %p1128_p11 = pnand %p1127_p9, %p1121_p10 }
 0x1be   : > { %v398_v21 = vpop.permute.xlu1 %397  ;;  %v392_v22 = vpop.permute.xlu0 %391 }
 0x1bf   : > { %v416_v25 = vcombine.low %v392_v22, %v398_v21  ;;  %v417_v26 = vcombine.high %v392_v22, %v398_v21 }
 0x1c1   : > { %v424_v32 = vrot.slane %v416_v25, %v1476_v24  ;;  %v431_v33 = vrot.slane %v417_v26, %v1476_v24 }
 0x1c2   : > { %v547_v27 = vpop.permute.xlu1 %546  ;;  %v395_v28 = vpop.permute.xlu0 %394 }
 0x1c3   : > { %v400_v29 = vcombine.low %v328_v6, %v395_v28  ;;  %v401_v30 = vcombine.high %v328_v6, %v395_v28 }
 0x1c5   : > { %v408_v34 = vrot.slane %v400_v29, %v1476_v24  ;;  %v415_v35 = vrot.slane %v401_v30, %v1476_v24 }
 0x1c6   : > { %v553_v36 = vpop.permute.xlu1 %552  ;;  %v550_v37 = vpop.permute.xlu0 %549 }
 0x1c7   : > { %v432_v38 = vcombine.low %v408_v34, %v424_v32  ;;  %v433_v39 = vcombine.high %v408_v34, %v424_v32  ;;  %v448_v40 = vcombine.low %v415_v35, %v431_v33  ;;  %v449_v41 = vcombine.high %v415_v35, %v431_v33 }
 0x1c8   : > { %v571_v42 = vcombine.low %v547_v27, %v553_v36  ;;  %v572_v43 = vcombine.high %v547_v27, %v553_v36  ;;  %v555_v44 = vcombine.low %v384_v7, %v550_v37  ;;  %v556_v45 = vcombine.high %v384_v7, %v550_v37 }
 0x1c9   : > { %v440_v46 = vrot.slane %v432_v38, %v1478_v31  ;;  %v447_v47 = vrot.slane %v433_v39, %v1478_v31  ;;  %v456_v48 = vrot.slane %v448_v40, %v1478_v31  ;;  %v463_v49 = vrot.slane %v449_v41, %v1478_v31 }
 0x1ca   : > { %v579_v50 = vrot.slane %v571_v42, %v1476_v24  ;;  %v586_v51 = vrot.slane %v572_v43, %v1476_v24  ;;  %v563_v52 = vrot.slane %v555_v44, %v1476_v24  ;;  %v570_v53 = vrot.slane %v556_v45, %v1476_v24 }
 0x1cb   : > { %v468_v54 = vcombine.low %v440_v46, %v447_v47  ;;  %v893_v55 = vcombine.high %v440_v46, %v447_v47  ;;  %v484_v56 = vcombine.low %v456_v48, %v463_v49  ;;  %v894_v57 = vcombine.high %v456_v48, %v463_v49 }
 0x1cc   : > { %v587_v58 = vcombine.low %v563_v52, %v579_v50  ;;  %v588_v59 = vcombine.high %v563_v52, %v579_v50  ;;  %v603_v60 = vcombine.low %v570_v53, %v586_v51  ;;  %v604_v61 = vcombine.high %v570_v53, %v586_v51 }
 0x1cd   : > { %v475_v62 = vrot.slane %v468_v54, %v1476_v24  ;;  %v483_v63 = vrot.slane %v893_v55, %v1476_v24  ;;  %v491_v0 = vrot.slane %v484_v56, %v1476_v24  ;;  %v499_v1 = vrot.slane %v894_v57, %v1476_v24 }
 0x1ce   : > { %v595_v2 = vrot.slane %v587_v58, %v1478_v31  ;;  %v602_v3 = vrot.slane %v588_v59, %v1478_v31  ;;  %v611_v4 = vrot.slane %v603_v60, %v1478_v31  ;;  %v618_v5 = vrot.slane %v604_v61, %v1478_v31 }
 0x1cf   : > { %v500_v6 = vcombine.low %v475_v62, %v483_v63  ;;  %v501_v7 = vcombine.high %v475_v62, %v483_v63  ;;  %v516_v8 = vcombine.low %v491_v0, %v499_v1  ;;  %v517_v9 = vcombine.high %v491_v0, %v499_v1 }
 0x1d0   : > { %v623_v10 = vcombine.low %v595_v2, %v602_v3  ;;  %v895_v11 = vcombine.high %v595_v2, %v602_v3  ;;  %v639_v12 = vcombine.low %v611_v4, %v618_v5  ;;  %v896_v13 = vcombine.high %v611_v4, %v618_v5 }
 0x1d1   : > { %v508_v14 = vrot.slane %v500_v6, %v1478_v31  ;;  %v515_v15 = vrot.slane %v501_v7, %v1478_v31  ;;  %v524_v16 = vrot.slane %v516_v8, %v1478_v31  ;;  %v531_v17 = vrot.slane %v517_v9, %v1478_v31 }
 0x1d2   : > { %v630_v18 = vrot.slane %v623_v10, %v1476_v24  ;;  %v638_v19 = vrot.slane %v895_v11, %v1476_v24  ;;  %v646_v20 = vrot.slane %v639_v12, %v1476_v24  ;;  %v654_v21 = vrot.slane %v896_v13, %v1476_v24 }
 0x1d3   : > { %v532_v22 = vcombine.low %v508_v14, %v524_v16  ;;  %v533_v23 = vcombine.high %v508_v14, %v524_v16  ;;  %v534_v25 = vcombine.low %v515_v15, %v531_v17  ;;  %v535_v26 = vcombine.high %v515_v15, %v531_v17 }
 0x1d4   : > { %v655_v27 = vcombine.low %v630_v18, %v638_v19  ;;  %v656_v28 = vcombine.high %v630_v18, %v638_v19  ;;  %v671_v29 = vcombine.low %v646_v20, %v654_v21  ;;  %v672_v30 = vcombine.high %v646_v20, %v654_v21 }
 0x1d5   : > { %v536_v32 = vpack.c.bf16 %v532_v22, %v532_v22  ;;  %v537_v33 = vpack.c.bf16 %v533_v23, %v533_v23  ;;  %v538_v24 = vpack.c.bf16 %v534_v25, %v534_v25  ;;  %v539_v34 = vpack.c.bf16 %v535_v26, %v535_v26 }
 0x1d6   : > { %v663_v35 = vrot.slane %v655_v27, %v1478_v31  ;;  %v670_v36 = vrot.slane %v656_v28, %v1478_v31  ;;  %v679_v37 = vrot.slane %v671_v29, %v1478_v31  ;;  %v686_v38 = vrot.slane %v672_v30, %v1478_v31 }
 0x1d7   : > { %541 = vst.msk [vmem:[%s264_s29] sm:$0xf] %vm540_vm2, %v536_v32  ;;  %542 = vst.msk [vmem:[%s264_s29 + $0x4] sm:$0xf] %vm540_vm2, %v537_v33 }
 0x1d8   : > { %543 = vst.msk [vmem:[%s264_s29 + $0x8] sm:$0xf] %vm540_vm2, %v538_v24  ;;  %544 = vst.msk [vmem:[%s264_s29 + $0xc] sm:$0xf] %vm540_vm2, %v539_v34  ;;  %v687_v39 = vcombine.low %v663_v35, %v679_v37  ;;  %v688_v40 = vcombine.high %v663_v35, %v679_v37  ;;  %v689_v41 = vcombine.low %v670_v36, %v686_v38 }
 0x1d9   : > { %v690_v42 = vcombine.high %v670_v36, %v686_v38 }
 0x1da   : > { %1131 = shalt.err (!%p1128_p11)
}
 0x1db   : > { %s1132_s27 = scalar_lea.hbm %s1517_s11, 256  ;;  %s1136_s10 = scalar_lea.hbm %s1633_s3, 512 }
 0x1dc   : > { %p1133_p0 = scmp.ne.s32.totalorder %s1517_s11, %s1132_s27  ;;  %p1137_p6 = scmp.lt.u32.totalorder %s1517_s11, %s1633_s3 }
 0x1dd   : > { %p1138_p7 = scmp.lt.u32.totalorder %s1136_s10, %s1132_s27  ;;  %p1140_p8 = scmp.lt.u32.totalorder %s1132_s27, %s1517_s11 }
 0x1de   : > { %p1134_p4 = pnand %p1133_p0, %p1649_p2 }
 0x1df   : > { %p1139_p12 = por %p1138_p7, %p1137_p6 }
 0x1e0   : > { %p1135_p13 = pneg %p1134_p4 }
 0x1e1   : > { %p1141_p1 = por %p1140_p8, %p1139_p12 }
 0x1e3   : > { %p1142_p10 = pnand %p1141_p1, %p1135_p13 }
 0x1e5   : > { %1145 = shalt.err (!%p1142_p10)
}
 0x1e6   : > { %s1251_s6 = smov 64   ;;  %s1252_s23 = smov 4   ;;  %v691_v31 = vpack.c.bf16 %v687_v39, %v687_v39  ;;  %v692_v43 = vpack.c.bf16 %v688_v40, %v688_v40  ;;  %v693_v44 = vpack.c.bf16 %v689_v41, %v689_v41  ;;  %v694_v45 = vpack.c.bf16 %v690_v42, %v690_v42 }
 0x1e7   : > { %939 = dma.vmem_to_hbm [thread:$0]  (%p1649_p2), %s1519_s14, 256, %s1517_s11, %s700_s8, %s1251_s6, %s1251_s6, %s1252_s23  }
 0x1e8   : > { %s1566_s12 = scalar_lea.hbm %s1634_s4, %s905_s13  ;;  %695 = vst.msk [vmem:[%s1531_s24] sm:$0xf] %vm540_vm2, %v691_v31  ;;  %696 = vst.msk [vmem:[%s1531_s24 + $0x4] sm:$0xf] %vm540_vm2, %v692_v43  ;;  %s705_s18 = scalar_lea.sflag [#allocation10], %s1464_s28 }
 0x1e9   : > { %697 = vst.msk [vmem:[%s1531_s24 + $0x8] sm:$0xf] %vm540_vm2, %v693_v44  ;;  %698 = vst.msk [vmem:[%s1531_s24 + $0xc] sm:$0xf] %vm540_vm2, %v694_v45  ;;  %s1146_s14 = scalar_lea.vmem %s1570_s7, 256  ;;  %s1253_s13 = smov [#allocation9]  }
 0x1ea   : > { %p1147_p3 = scmp.ne.s32.totalorder %s1570_s7, %s1146_s14  ;;  %s1150_s11 = sshll.u32 %s1253_s13, 4  ;;  %s1151_s11 = int_to_ptr.vmem [resolvable:$false] %s1150_s11 }
 0x1eb   : > { %s1152_s8 = scalar_lea.vmem %s1151_s11, 512  ;;  %p1153_p11 = scmp.lt.s32.totalorder %s1570_s7, %s1151_s11 }
 0x1ec   : > { %p1148_p5 = pnand %p1147_p3, %p1649_p2  ;;  %p1154_p0 = scmp.lt.s32.totalorder %s1152_s8, %s1146_s14 }
 0x1ee   : > { %p1149_p9 = pneg %p1148_p5  ;;  %p1155_p4 = por %p1154_p0, %p1153_p11 }
 0x1f0   : > { %p1156_p13 = pnand %p1155_p4, %p1149_p9 }
 0x1f2   : > { %1159 = shalt.err (!%p1156_p13)
}
 0x1f3   : > { %s1160_s24 = scalar_lea.hbm %s1566_s12, 256  ;;  %s1164_s9 = scalar_lea.hbm %s1634_s4, 512 }
 0x1f4   : > { %p1161_p6 = scmp.ne.s32.totalorder %s1566_s12, %s1160_s24  ;;  %p1165_p8 = scmp.lt.u32.totalorder %s1566_s12, %s1634_s4 }
 0x1f5   : > { %p1166_p1 = scmp.lt.u32.totalorder %s1164_s9, %s1160_s24  ;;  %p1168_p3 = scmp.lt.u32.totalorder %s1160_s24, %s1566_s12 }
 0x1f6   : > { %p1162_p7 = pnand %p1161_p6, %p1649_p2 }
 0x1f7   : > { %p1167_p10 = por %p1166_p1, %p1165_p8 }
 0x1f8   : > { %p1163_p12 = pneg %p1162_p7 }
 0x1f9   : > { %p1169_p5 = por %p1168_p3, %p1167_p10 }
 0x1fb   : > { %p1170_p9 = pnand %p1169_p5, %p1163_p12 }
 0x1fd   : > { %1173 = shalt.err (!%p1170_p9)
}
 0x1fe   : > { %940 = dma.vmem_to_hbm [thread:$0]  (%p1649_p2), %s1570_s7, 256, %s1566_s12, %s705_s18, %s1251_s6, %s1251_s6, %s1252_s23  }
 0x1ff PF: > { %s751_s27 = sand.u32 1, %s1216_s15   ;;  %p1650_p11 = scmp.ne.s32.totalorder %s1642_s26, 0 }
 0x200   : > { %p1651_p0 = scmp.ge.s32.totalorder %s1236_s20, 2  ;;  %s752_s14 = scalar_lea.sflag [#allocation4], %s751_s27 }
 0x202   : > { %p955_p4 = pnand %p1651_p0, %p1650_p11 }
 0x204   : > { %1207 = dma.done.wait (!%p955_p4), %s752_s14, 256  }
 0x205   : > { %1209 = vsyncadd (!%p955_p4), %s752_s14, 4294967040  ;;  %s761_s30 = scalar_lea.sflag [#allocation10], %s751_s27 }
 0x206   : > { %1211 = dma.done.wait (!%p955_p4), %s761_s30, 256  }
 0x207   : > { %1213 = vsyncadd (!%p955_p4), %s761_s30, 4294967040  ;;  %s25_s20 = sadd.s32 1, %s1236_s20   ;;  %s1652_s15 = smov %s1220_s16 }
 0x208   : > { %p22_p13 = scmp.ge.s32.totalorder %s25_s20, 4   ;;  %s1653_s16 = smov %s1224_s17 }
 0x209   : > { %s1654_s17 = smov %s1421_s22  ;;  %s1655_s18 = smov %s1232_s19 }
 0x20a   : > { %s1656_s19 = smov %s1658_s5  ;;  %24 = sbr.rel (!%p22_p13) target bundleno = 9 (0x9), region = 102 }
 0x211   :  { %766 = vsyncpa [#allocation3], 1 }
 0x212   :  { %768 = vsyncpa [#allocation3 + $0x1], 1 }
 0x213   :  { %769 = vsyncpa [#allocation6], 1 }
 0x214   :  { %770 = vsyncpa [#allocation4], 1 }
 0x215   :  { %772 = vsyncpa [#allocation4 + $0x1], 1 }
 0x216   :  { %773 = vsyncpa [#allocation10], 1 }
 0x217   :  { %775 = vsyncpa [#allocation10 + $0x1], 1 }

// kernel: tpu_custom_call.1
= control target key start
LH: loop header
LB: loop body
LE: loop exit
PB: predicated region body
PF: predicated region fallthrough
CT: control target
= control target key end

     0   :  { %10 = vsyncpa [#allocation3], 0  ;;  %s1630_s0 = inlined_call_operand.hbm [shape: bf16[2,8,32], index: 0, kind: input, shape index: {}]   ;;  %s1631_s1 = inlined_call_operand.hbm [shape: bf16[32,32], index: 1, kind: input, shape index: {}]   ;;  %s1632_s2 = inlined_call_operand.hbm [shape: bf16[32,32], index: 2, kind: input, shape index: {}]   ;;  %s1633_s3 = inlined_call_operand.hbm [shape: bf16[2,4,8,8], index: 3, kind: output, shape index: {0}]   ;;  %s1634_s4 = inlined_call_operand.hbm [shape: bf16[2,4,8,8], index: 4, kind: output, shape index: {1}]  }
   0x1   :  { %12 = vsyncpa [#allocation3 + $0x1], 0 }
   0x2   :  { %13 = vsyncpa [#allocation6], 0 }
   0x3   :  { %14 = vsyncpa [#allocation4], 0 }
   0x4   :  { %16 = vsyncpa [#allocation4 + $0x1], 0 }
   0x5   :  { %17 = vsyncpa [#allocation10], 0 }
   0x6   :  { %19 = vsyncpa [#allocation10 + $0x1], 0  ;;  %s1279_s15 = smov 0   ;;  %s1281_s16 = smov 0  }
   0x7   :  { %s1283_s17 = smov 0   ;;  %s1285_s18 = smov 0  }
   0x8   :  { %s1287_s19 = smov 0   ;;  %s1289_s20 = smov 0  }
   0x9 LB: > { %s873_s21 = sadd.s32 4294967295, %s1236_s20   ;;  %s874_s22 = sadd.s32 4294967294, %s1236_s20   ;;  %s1236_s20 = sphi %s1289_s20, %s25_s20   ;;  %s1232_s19 = sphi %s1287_s19, %s1656_s19   ;;  %s1228_s18 = sphi %s1285_s18, %s1655_s18   ;;  %s1224_s17 = sphi %s1283_s17, %s1654_s17   ;;  %s1220_s16 = sphi %s1281_s16, %s1653_s16   ;;  %s1216_s15 = sphi %s1279_s15, %s1652_s15  }
   0xa   : > { %p59_p0 = scmp.ne.s32.totalorder %s1220_s16, %s1216_s15  ;;  %p1313_p1 = scmp.eq.s32.totalorder %s873_s21, 0 }
   0xb   : > { %p1317_p2 = scmp.eq.s32.totalorder %s873_s21, 1  ;;  %p133_p3 = scmp.eq.s32.totalorder %s874_s22, 1 }
   0xc   : > { %s1639_s23 = scalar_select %p1313_p1, 1, 0 }
   0xd   : > { %p1323_p4 = por %p1313_p1, %p59_p0  ;;  %p875_p5 = scmp.ge.s32.totalorder %s1236_s20, 1 }
   0xe   : > { %p1328_p6 = por %p133_p3, %p59_p0  ;;  %p168_p7 = scmp.lt.s32.totalorder %s1236_s20, 3 }
   0xf   : > { %s1641_s25 = scalar_select %p1323_p4, 1, 0 }
  0x10   : > { %s1642_s26 = scalar_select %p1328_p6, 1, 0 }
  0x11   : > { %p1333_p8 = pnand %p875_p5, %p168_p7  ;;  %s1238_s28 = smov [#allocation5]  }
  0x12   : > { %s180_s29 = sshll.u32 %s1238_s28, 4  ;;  %s1239_s5 = smov [#allocation7]   ;;  %s1337_s29 = int_to_ptr.vmem [resolvable:$true] %s180_s29 }
  0x13   : > { %p943_p9 = pneg %p1333_p8  ;;  %s193_s6 = sshll.u32 %s1239_s5, 4  ;;  %s1348_s6 = int_to_ptr.vmem [resolvable:$true] %s193_s6 }
  0x14   : > { %s1032_s9 = scalar_lea.hbm %s1631_s1, 256 }
  0x15   : > { %p1344_p11 = pnand %p943_p9, %p1313_p1  ;;  %p1033_p12 = scmp.ne.s32.totalorder %s1631_s1, %s1032_s9 }
  0x16   : > { %p1039_p5 = scmp.lt.u32.totalorder %s1032_s9, %s1631_s1 }
  0x17   : > { %p1034_p13 = pneg %p1344_p11 }
  0x19   : > { %p1035_p0 = pnand %p1034_p13, %p1033_p12 }
  0x1b   : > { %p1036_p3 = pneg %p1035_p0 }
  0x1d   : > { %p1041_p7 = pnand %p1039_p5, %p1036_p3 }
  0x1f   : > { %1044 = shalt.err (!%p1041_p7)
}
  0x20   : > { %s1045_s14 = scalar_lea.vmem %s1337_s29, 256  ;;  %p1053_p1 = scmp.lt.s32.totalorder %s1337_s29, %s1337_s29 }
  0x21   : > { %p1046_p9 = scmp.ne.s32.totalorder %s1337_s29, %s1045_s14  ;;  %p1054_p12 = scmp.lt.s32.totalorder %s1045_s14, %s1045_s14 }
  0x23   : > { %p1048_p10 = pnand %p1046_p9, %p1034_p13  ;;  %p1055_p0 = por %p1054_p12, %p1053_p1 }
  0x25   : > { %p1049_p6 = pneg %p1048_p10 }
  0x27   : > { %p1056_p4 = pnand %p1055_p0, %p1049_p6 }
  0x29   : > { %1059 = shalt.err (!%p1056_p4)
}
  0x2a   : > { %s1240_s21 = smov 64   ;;  %s1241_s22 = smov 4  }
  0x2b   : > { %946 = dma.hbm_to_vmem [thread:$0]  (!%p1344_p11), %s1631_s1, 256, %s1337_s29, [#allocation6], %s1240_s21, %s1240_s21, %s1241_s22  }
  0x2c   : > { %s1060_s9 = scalar_lea.hbm %s1632_s2, 256 }
  0x2d   : > { %p1061_p1 = scmp.ne.s32.totalorder %s1632_s2, %s1060_s9  ;;  %p1067_p10 = scmp.lt.u32.totalorder %s1060_s9, %s1632_s2 }
  0x2f   : > { %p1063_p4 = pnand %p1061_p1, %p1034_p13 }
  0x31   : > { %p1064_p6 = pneg %p1063_p4 }
  0x33   : > { %p1069_p3 = pnand %p1067_p10, %p1064_p6 }
  0x35   : > { %1072 = shalt.err (!%p1069_p3)
}
  0x36   : > { %s1073_s29 = scalar_lea.vmem %s1348_s6, 256  ;;  %p1081_p12 = scmp.lt.s32.totalorder %s1348_s6, %s1348_s6 }
  0x37   : > { %p1074_p5 = scmp.ne.s32.totalorder %s1348_s6, %s1073_s29  ;;  %p1082_p0 = scmp.lt.s32.totalorder %s1073_s29, %s1073_s29 }
  0x39   : > { %p1076_p7 = pnand %p1074_p5, %p1034_p13  ;;  %p1083_p1 = por %p1082_p0, %p1081_p12 }
  0x3b   : > { %p1077_p9 = pneg %p1076_p7 }
  0x3d   : > { %p1084_p4 = pnand %p1083_p1, %p1077_p9 }
  0x3f   : > { %1087 = shalt.err (!%p1084_p4)
}
  0x40   : > { %949 = dma.hbm_to_vmem [thread:$0]  (!%p1344_p11), %s1632_s2, 256, %s1348_s6, [#allocation6], %s1240_s21, %s1240_s21, %s1241_s22  }
  0x41   : > { %s37_s5 = sadd.s32 1, %s1232_s19  ;;  %s46_s7 = sadd.s32 1, %s1224_s17 }
  0x42   : > { %p39_p13 = scmp.ge.s32.totalorder %s37_s5, 2  ;;  %p53_p6 = scmp.ne.s32.totalorder %s1224_s17, %s1220_s16 }
  0x43   : > { %p54_p10 = scmp.eq.s32.totalorder %s1236_s20, 0  ;;  %p963_p3 = scmp.lt.s32.totalorder %s1236_s20, 2 }
  0x44   : > { %s1658_s5 = smov (%p39_p13, %s37_s5), 0  ;;  %p1412_p7 = por %p1317_p2, %p53_p6 }
  0x45   : > { %p55_p5 = por %p54_p10, %p53_p6  ;;  %s41_s8 = ssub.s32 %s1232_s19, %s1658_s5 }
  0x46   : > { %s1645_s30 = scalar_select %p1412_p7, 1, 0 }
  0x47   : > { %s207_s9 = sand.u32 1, %s1224_s17   ;;  %p44_p9 = scmp.eq.s32.totalorder %s41_s8, 0 }
  0x48   : > { %s879_s6 = sshll.u32 %s207_s9, 2  ;;  %s880_s21 = sshll.u32 %s1232_s19, 6 }
  0x49   : > { %s1421_s22 = scalar_select %p44_p9, %s1224_s17, %s46_s7  }
  0x4a   : > { %s1426_s12 = scalar_lea.hbm %s1630_s0, %s880_s21  ;;  %s211_s24 = scalar_lea.vmem [#allocation2], %s879_s6 }
  0x4b   : > { %s219_s13 = sshll.u32 %s211_s24, 4  ;;  %p1430_p2 = pnand %p963_p3, %p55_p5  ;;  %s1434_s13 = int_to_ptr.vmem [resolvable:$true] %s219_s13 }
  0x4c   : > { %s208_s14 = scalar_lea.sflag [#allocation3], %s207_s9  ;;  %s1088_s28 = scalar_lea.hbm %s1426_s12, 64 }
  0x4d   : > { %p1089_p11 = scmp.ne.s32.totalorder %s1426_s12, %s1088_s28  ;;  %p1090_p12 = pneg %p1430_p2 }
  0x4e   : > { %s1093_s6 = scalar_lea.hbm %s1630_s0, 128  ;;  %p1094_p4 = scmp.lt.u32.totalorder %s1426_s12, %s1630_s0 }
  0x4f   : > { %p1091_p0 = pnand %p1090_p12, %p1089_p11  ;;  %p1095_p13 = scmp.lt.u32.totalorder %s1093_s6, %s1088_s28 }
  0x50   : > { %p1097_p10 = scmp.lt.u32.totalorder %s1088_s28, %s1426_s12 }
  0x51   : > { %p1092_p1 = pneg %p1091_p0  ;;  %p1096_p6 = por %p1095_p13, %p1094_p4 }
  0x53   : > { %p1098_p3 = por %p1097_p10, %p1096_p6 }
  0x55   : > { %p1099_p5 = pnand %p1098_p3, %p1092_p1 }
  0x57   : > { %1102 = shalt.err (!%p1099_p5)
}
  0x58   : > { %s1103_s9 = scalar_lea.vmem %s1434_s13, 64  ;;  %s1242_s11 = smov [#allocation2]  }
  0x59   : > { %p1104_p9 = scmp.ne.s32.totalorder %s1434_s13, %s1103_s9  ;;  %s1108_s24 = sshll.u32 %s1242_s11, 4  ;;  %s1109_s24 = int_to_ptr.vmem [resolvable:$false] %s1108_s24 }
  0x5a   : > { %s1110_s7 = scalar_lea.vmem %s1109_s24, 128  ;;  %p1111_p7 = scmp.lt.s32.totalorder %s1434_s13, %s1109_s24 }
  0x5b   : > { %p1106_p11 = pnand %p1104_p9, %p1090_p12  ;;  %p1112_p4 = scmp.lt.s32.totalorder %s1110_s7, %s1103_s9 }
  0x5d   : > { %p1107_p0 = pneg %p1106_p11  ;;  %p1113_p13 = por %p1112_p4, %p1111_p7 }
  0x5f   : > { %p1114_p6 = pnand %p1113_p13, %p1107_p0 }
  0x61   : > { %1117 = shalt.err (!%p1114_p6)
}
  0x62   : > { %953 = dma.hbm_to_vmem [thread:$0]  (!%p1430_p2), %s1426_s12, 64, %s1434_s13, %s208_s14  }
  0x63   : > { %228 = sbr.rel (%p1333_p8) target bundleno = 511 (0x1ff), region = 32  ;;  %s1464_s28 = sand.u32 (!%p1333_p8), 1, %s1220_s16  }
  0x64   : > { %s882_s8 = sshll.u32 (!%p1333_p8), %s1464_s28, 2  ;;  %s231_s6 = scalar_lea.sflag (!%p1333_p8), [#allocation3], %s1464_s28 }
  0x65   : > { %s234_s21 = scalar_lea.vmem (!%p1333_p8), [#allocation2], %s882_s8  ;;  %p1647_p7 = scmp.ne.s32.totalorder (!%p1333_p8), %s1641_s25, 0 }
  0x6a   : > { %1199 = dma.done.wait (%p1647_p7), %s231_s6, 64  }
  0x6b   : > { %1201 = vsyncadd (%p1647_p7), %s231_s6, 4294967232  ;;  %p1648_p12 = scmp.ne.s32.totalorder %s1639_s23, 0 }
  0x6d   : > { %1203 = dma.done.wait (%p1648_p12), [#allocation6], 512  }
  0x6e   : > { %1205 = vsyncadd (%p1648_p12), [#allocation6], 4294966784  ;;  %v1243_v0 = vmov 0.0   ;;  %vm1244_vm0 = vmmov 0   ;;  %v1028_v1 = vld [vmem:[#allocation5] sm:$0xff]   ;;  %v1029_v2 = vld [vmem:[#allocation7] sm:$0xff]   ;;  %v405_v16 = vlaneseq }
  0x6f   : > { %913 = vmatprep.subr.bf16.mxu0 %v1243_v0  ;;  %921 = vmatprep.subr.bf16.mxu1 %v1243_v0  ;;  %v1030_v3 = vld [vmem:[#allocation5 + $0x8] sm:$0xff]   ;;  %v1031_v4 = vld [vmem:[#allocation7 + $0x8] sm:$0xff]   ;;  %vm290_vm1 = vcmask 261120   ;;  %s1245_s23 = smov 104   ;;  %s1246_s25 = smov 120   ;;  %vm540_vm2 = vcmask 60416  }
  0x70   : > { %917 = vmatprep.mubr.msk.bf16.mxu0 %vm1244_vm0, %v1243_v0  ;;  %925 = vmatprep.mubr.msk.bf16.mxu1 %vm1244_vm0, %v1243_v0  ;;  %v273_v5 = vld [vmem:[%s234_s21] sm:$0xf]  ;;  %s1247_s27 = smov 112   ;;  %v1248_v14 = vmov 1983009808   ;;  %v406_v20 = vshrl.u32 %v405_v16, 7 }
  0x71   : > { %914 = vmatpush3.bf16.msra.mxu0 %v1028_v1  ;;  %922 = vmatpush3.bf16.msra.mxu1 %v1029_v2  ;;  %v403_v15 = vunpack.c.l.s4 %v1248_v14  ;;  %v1249_v17 = vmov 1934713408   ;;  %s885_s12 = sshll.u32 %s1464_s28, 4  ;;  %s905_s13 = sshll.u32 %s1228_s18, 8 }
  0x72   : > { %915 = vmatprep.subr.bf16.mxu0 %v1243_v0  ;;  %923 = vmatprep.subr.bf16.mxu1 %v1243_v0  ;;  %v435_v18 = vunpack.c.l.s4 %v1249_v17  ;;  %s264_s29 = scalar_lea.vmem [#allocation8], %s885_s12  ;;  %s1517_s11 = scalar_lea.hbm %s1633_s3, %s905_s13 }
  0x73   : > { %v404_v19 = vunpack.c.0.s8 %v403_v15  ;;  %s719_s14 = sshll.u32 %s264_s29, 4  ;;  %s1531_s24 = scalar_lea.vmem [#allocation9], %s885_s12  ;;  %s1519_s14 = int_to_ptr.vmem [resolvable:$true] %s719_s14 }
  0x74   : > { %v436_v23 = vunpack.c.0.s8 %v435_v18  ;;  %s736_s7 = sshll.u32 %s1531_s24, 4  ;;  %s700_s8 = scalar_lea.sflag [#allocation4], %s1464_s28  ;;  %s1570_s7 = int_to_ptr.vmem [resolvable:$true] %s736_s7 }
  0x75   : > { %916 = vmatpush3.bf16.msra.mxu0 %v1030_v3  ;;  %924 = vmatpush3.bf16.msra.mxu1 %v1031_v4  ;;  %v1476_v24 = vsub.s32 %v404_v19, %v406_v20  ;;  %s1118_s6 = scalar_lea.vmem %s1519_s14, 256  ;;  %p1649_p2 = scmp.ne.s32.totalorder %s1645_s30, 0 }
  0x76   : > { %v1478_v31 = vsub.s32 %v436_v23, %v406_v20  ;;  %p1119_p8 = scmp.ne.s32.totalorder %s1519_s14, %s1118_s6  ;;  %s1250_s21 = smov [#allocation8]  }
  0x78   : > { %918 = vmatmul.mubr.msk.bf16.vlgmr.msra.gmra.mrb[0].mxu0 %vm290_vm1, %v273_v5  ;;  %926 = vmatmul.mubr.msk.bf16.vlgmr.msra.gmra.mrb[0].mxu1 %vm290_vm1, %v273_v5  ;;  %p1120_p1 = pnand %p1119_p8, %p1649_p2 }
  0x7a   : > { %p1121_p10 = pneg %p1120_p1 }
 0x14b   : > { %v328_v6 = vpop.f32.mrb[0].mxu0  ;;  %v384_v7 = vpop.f32.mrb[0].mxu1 }
 0x14c   : > { %397 = vrot.lane.b32.xlu1 %v328_v6, %s1245_s23  ;;  %391 = vrot.lane.b32.xlu0 %v328_v6, %s1246_s25  ;;  %v919_v8 = vpop.f32.mrb[1].mxu0  ;;  %v927_v10 = vpop.f32.mrb[1].mxu1 }
 0x14d   : > { %v331_v9 = vpop.f32.mrb[2].mxu0  ;;  %v387_v12 = vpop.f32.mrb[2].mxu1 }
 0x14e   : > { %v920_v11 = vpop.f32.mrb[3].mxu0  ;;  %v928_v13 = vpop.f32.mrb[3].mxu1 }
 0x150   : > { %546 = vrot.lane.b32.xlu1 %v384_v7, %s1246_s25  ;;  %394 = vrot.lane.b32.xlu0 %v328_v6, %s1247_s27 }
 0x154   : > { %552 = vrot.lane.b32.xlu1 %v384_v7, %s1245_s23  ;;  %549 = vrot.lane.b32.xlu0 %v384_v7, %s1247_s27  ;;  %s1122_s23 = sshll.u32 %s1250_s21, 4  ;;  %s1123_s23 = int_to_ptr.vmem [resolvable:$false] %s1122_s23 }
 0x155   : > { %s1124_s25 = scalar_lea.vmem %s1123_s23, 512  ;;  %p1125_p3 = scmp.lt.s32.totalorder %s1519_s14, %s1123_s23 }
 0x156   : > { %p1126_p5 = scmp.lt.s32.totalorder %s1124_s25, %s1118_s6 }
 0x158   : > { %p1127_p9 = por %p1126_p5, %p1125_p3 }
 0x15a   : > { %p1128_p11 = pnand %p1127_p9, %p1121_p10 }
 0x1be   : > { %v398_v21 = vpop.permute.xlu1 %397  ;;  %v392_v22 = vpop.permute.xlu0 %391 }
 0x1bf   : > { %v416_v25 = vcombine.low %v392_v22, %v398_v21  ;;  %v417_v26 = vcombine.high %v392_v22, %v398_v21 }
 0x1c1   : > { %v424_v32 = vrot.slane %v416_v25, %v1476_v24  ;;  %v431_v33 = vrot.slane %v417_v26, %v1476_v24 }
 0x1c2   : > { %v547_v27 = vpop.permute.xlu1 %546  ;;  %v395_v28 = vpop.permute.xlu0 %394 }
 0x1c3   : > { %v400_v29 = vcombine.low %v328_v6, %v395_v28  ;;  %v401_v30 = vcombine.high %v328_v6, %v395_v28 }
 0x1c5   : > { %v408_v34 = vrot.slane %v400_v29, %v1476_v24  ;;  %v415_v35 = vrot.slane %v401_v30, %v1476_v24 }
 0x1c6   : > { %v553_v36 = vpop.permute.xlu1 %552  ;;  %v550_v37 = vpop.permute.xlu0 %549 }
 0x1c7   : > { %v432_v38 = vcombine.low %v408_v34, %v424_v32  ;;  %v433_v39 = vcombine.high %v408_v34, %v424_v32  ;;  %v448_v40 = vcombine.low %v415_v35, %v431_v33  ;;  %v449_v41 = vcombine.high %v415_v35, %v431_v33 }
 0x1c8   : > { %v571_v42 = vcombine.low %v547_v27, %v553_v36  ;;  %v572_v43 = vcombine.high %v547_v27, %v553_v36  ;;  %v555_v44 = vcombine.low %v384_v7, %v550_v37  ;;  %v556_v45 = vcombine.high %v384_v7, %v550_v37 }
 0x1c9   : > { %v440_v46 = vrot.slane %v432_v38, %v1478_v31  ;;  %v447_v47 = vrot.slane %v433_v39, %v1478_v31  ;;  %v456_v48 = vrot.slane %v448_v40, %v1478_v31  ;;  %v463_v49 = vrot.slane %v449_v41, %v1478_v31 }
 0x1ca   : > { %v579_v50 = vrot.slane %v571_v42, %v1476_v24  ;;  %v586_v51 = vrot.slane %v572_v43, %v1476_v24  ;;  %v563_v52 = vrot.slane %v555_v44, %v1476_v24  ;;  %v570_v53 = vrot.slane %v556_v45, %v1476_v24 }
 0x1cb   : > { %v468_v54 = vcombine.low %v440_v46, %v447_v47  ;;  %v893_v55 = vcombine.high %v440_v46, %v447_v47  ;;  %v484_v56 = vcombine.low %v456_v48, %v463_v49  ;;  %v894_v57 = vcombine.high %v456_v48, %v463_v49 }
 0x1cc   : > { %v587_v58 = vcombine.low %v563_v52, %v579_v50  ;;  %v588_v59 = vcombine.high %v563_v52, %v579_v50  ;;  %v603_v60 = vcombine.low %v570_v53, %v586_v51  ;;  %v604_v61 = vcombine.high %v570_v53, %v586_v51 }
 0x1cd   : > { %v475_v62 = vrot.slane %v468_v54, %v1476_v24  ;;  %v483_v63 = vrot.slane %v893_v55, %v1476_v24  ;;  %v491_v0 = vrot.slane %v484_v56, %v1476_v24  ;;  %v499_v1 = vrot.slane %v894_v57, %v1476_v24 }
 0x1ce   : > { %v595_v2 = vrot.slane %v587_v58, %v1478_v31  ;;  %v602_v3 = vrot.slane %v588_v59, %v1478_v31  ;;  %v611_v4 = vrot.slane %v603_v60, %v1478_v31  ;;  %v618_v5 = vrot.slane %v604_v61, %v1478_v31 }
 0x1cf   : > { %v500_v6 = vcombine.low %v475_v62, %v483_v63  ;;  %v501_v7 = vcombine.high %v475_v62, %v483_v63  ;;  %v516_v8 = vcombine.low %v491_v0, %v499_v1  ;;  %v517_v9 = vcombine.high %v491_v0, %v499_v1 }
 0x1d0   : > { %v623_v10 = vcombine.low %v595_v2, %v602_v3  ;;  %v895_v11 = vcombine.high %v595_v2, %v602_v3  ;;  %v639_v12 = vcombine.low %v611_v4, %v618_v5  ;;  %v896_v13 = vcombine.high %v611_v4, %v618_v5 }
 0x1d1   : > { %v508_v14 = vrot.slane %v500_v6, %v1478_v31  ;;  %v515_v15 = vrot.slane %v501_v7, %v1478_v31  ;;  %v524_v16 = vrot.slane %v516_v8, %v1478_v31  ;;  %v531_v17 = vrot.slane %v517_v9, %v1478_v31 }
 0x1d2   : > { %v630_v18 = vrot.slane %v623_v10, %v1476_v24  ;;  %v638_v19 = vrot.slane %v895_v11, %v1476_v24  ;;  %v646_v20 = vrot.slane %v639_v12, %v1476_v24  ;;  %v654_v21 = vrot.slane %v896_v13, %v1476_v24 }
 0x1d3   : > { %v532_v22 = vcombine.low %v508_v14, %v524_v16  ;;  %v533_v23 = vcombine.high %v508_v14, %v524_v16  ;;  %v534_v25 = vcombine.low %v515_v15, %v531_v17  ;;  %v535_v26 = vcombine.high %v515_v15, %v531_v17 }
 0x1d4   : > { %v655_v27 = vcombine.low %v630_v18, %v638_v19  ;;  %v656_v28 = vcombine.high %v630_v18, %v638_v19  ;;  %v671_v29 = vcombine.low %v646_v20, %v654_v21  ;;  %v672_v30 = vcombine.high %v646_v20, %v654_v21 }
 0x1d5   : > { %v536_v32 = vpack.c.bf16 %v532_v22, %v532_v22  ;;  %v537_v33 = vpack.c.bf16 %v533_v23, %v533_v23  ;;  %v538_v24 = vpack.c.bf16 %v534_v25, %v534_v25  ;;  %v539_v34 = vpack.c.bf16 %v535_v26, %v535_v26 }
 0x1d6   : > { %v663_v35 = vrot.slane %v655_v27, %v1478_v31  ;;  %v670_v36 = vrot.slane %v656_v28, %v1478_v31  ;;  %v679_v37 = vrot.slane %v671_v29, %v1478_v31  ;;  %v686_v38 = vrot.slane %v672_v30, %v1478_v31 }
 0x1d7   : > { %541 = vst.msk [vmem:[%s264_s29] sm:$0xf] %vm540_vm2, %v536_v32  ;;  %542 = vst.msk [vmem:[%s264_s29 + $0x4] sm:$0xf] %vm540_vm2, %v537_v33 }
 0x1d8   : > { %543 = vst.msk [vmem:[%s264_s29 + $0x8] sm:$0xf] %vm540_vm2, %v538_v24  ;;  %544 = vst.msk [vmem:[%s264_s29 + $0xc] sm:$0xf] %vm540_vm2, %v539_v34  ;;  %v687_v39 = vcombine.low %v663_v35, %v679_v37  ;;  %v688_v40 = vcombine.high %v663_v35, %v679_v37  ;;  %v689_v41 = vcombine.low %v670_v36, %v686_v38 }
 0x1d9   : > { %v690_v42 = vcombine.high %v670_v36, %v686_v38 }
 0x1da   : > { %1131 = shalt.err (!%p1128_p11)
}
 0x1db   : > { %s1132_s27 = scalar_lea.hbm %s1517_s11, 256  ;;  %s1136_s10 = scalar_lea.hbm %s1633_s3, 512 }
 0x1dc   : > { %p1133_p0 = scmp.ne.s32.totalorder %s1517_s11, %s1132_s27  ;;  %p1137_p6 = scmp.lt.u32.totalorder %s1517_s11, %s1633_s3 }
 0x1dd   : > { %p1138_p7 = scmp.lt.u32.totalorder %s1136_s10, %s1132_s27  ;;  %p1140_p8 = scmp.lt.u32.totalorder %s1132_s27, %s1517_s11 }
 0x1de   : > { %p1134_p4 = pnand %p1133_p0, %p1649_p2 }
 0x1df   : > { %p1139_p12 = por %p1138_p7, %p1137_p6 }
 0x1e0   : > { %p1135_p13 = pneg %p1134_p4 }
 0x1e1   : > { %p1141_p1 = por %p1140_p8, %p1139_p12 }
 0x1e3   : > { %p1142_p10 = pnand %p1141_p1, %p1135_p13 }
 0x1e5   : > { %1145 = shalt.err (!%p1142_p10)
}
 0x1e6   : > { %s1251_s6 = smov 64   ;;  %s1252_s23 = smov 4   ;;  %v691_v31 = vpack.c.bf16 %v687_v39, %v687_v39  ;;  %v692_v43 = vpack.c.bf16 %v688_v40, %v688_v40  ;;  %v693_v44 = vpack.c.bf16 %v689_v41, %v689_v41  ;;  %v694_v45 = vpack.c.bf16 %v690_v42, %v690_v42 }
 0x1e7   : > { %939 = dma.vmem_to_hbm [thread:$0]  (%p1649_p2), %s1519_s14, 256, %s1517_s11, %s700_s8, %s1251_s6, %s1251_s6, %s1252_s23  }
 0x1e8   : > { %s1566_s12 = scalar_lea.hbm %s1634_s4, %s905_s13  ;;  %695 = vst.msk [vmem:[%s1531_s24] sm:$0xf] %vm540_vm2, %v691_v31  ;;  %696 = vst.msk [vmem:[%s1531_s24 + $0x4] sm:$0xf] %vm540_vm2, %v692_v43  ;;  %s705_s18 = scalar_lea.sflag [#allocation10], %s1464_s28 }
 0x1e9   : > { %697 = vst.msk [vmem:[%s1531_s24 + $0x8] sm:$0xf] %vm540_vm2, %v693_v44  ;;  %698 = vst.msk [vmem:[%s1531_s24 + $0xc] sm:$0xf] %vm540_vm2, %v694_v45  ;;  %s1146_s14 = scalar_lea.vmem %s1570_s7, 256  ;;  %s1253_s13 = smov [#allocation9]  }
 0x1ea   : > { %p1147_p3 = scmp.ne.s32.totalorder %s1570_s7, %s1146_s14  ;;  %s1150_s11 = sshll.u32 %s1253_s13, 4  ;;  %s1151_s11 = int_to_ptr.vmem [resolvable:$false] %s1150_s11 }
 0x1eb   : > { %s1152_s8 = scalar_lea.vmem %s1151_s11, 512  ;;  %p1153_p11 = scmp.lt.s32.totalorder %s1570_s7, %s1151_s11 }
 0x1ec   : > { %p1148_p5 = pnand %p1147_p3, %p1649_p2  ;;  %p1154_p0 = scmp.lt.s32.totalorder %s1152_s8, %s1146_s14 }
 0x1ee   : > { %p1149_p9 = pneg %p1148_p5  ;;  %p1155_p4 = por %p1154_p0, %p1153_p11 }
 0x1f0   : > { %p1156_p13 = pnand %p1155_p4, %p1149_p9 }
 0x1f2   : > { %1159 = shalt.err (!%p1156_p13)
}
 0x1f3   : > { %s1160_s24 = scalar_lea.hbm %s1566_s12, 256  ;;  %s1164_s9 = scalar_lea.hbm %s1634_s4, 512 }
 0x1f4   : > { %p1161_p6 = scmp.ne.s32.totalorder %s1566_s12, %s1160_s24  ;;  %p1165_p8 = scmp.lt.u32.totalorder %s1566_s12, %s1634_s4 }
 0x1f5   : > { %p1166_p1 = scmp.lt.u32.totalorder %s1164_s9, %s1160_s24  ;;  %p1168_p3 = scmp.lt.u32.totalorder %s1160_s24, %s1566_s12 }
 0x1f6   : > { %p1162_p7 = pnand %p1161_p6, %p1649_p2 }
 0x1f7   : > { %p1167_p10 = por %p1166_p1, %p1165_p8 }
 0x1f8   : > { %p1163_p12 = pneg %p1162_p7 }
 0x1f9   : > { %p1169_p5 = por %p1168_p3, %p1167_p10 }
 0x1fb   : > { %p1170_p9 = pnand %p1169_p5, %p1163_p12 }
 0x1fd   : > { %1173 = shalt.err (!%p1170_p9)
}
 0x1fe   : > { %940 = dma.vmem_to_hbm [thread:$0]  (%p1649_p2), %s1570_s7, 256, %s1566_s12, %s705_s18, %s1251_s6, %s1251_s6, %s1252_s23  }
 0x1ff PF: > { %s751_s27 = sand.u32 1, %s1216_s15   ;;  %p1650_p11 = scmp.ne.s32.totalorder %s1642_s26, 0 }
 0x200   : > { %p1651_p0 = scmp.ge.s32.totalorder %s1236_s20, 2  ;;  %s752_s14 = scalar_lea.sflag [#allocation4], %s751_s27 }
 0x202   : > { %p955_p4 = pnand %p1651_p0, %p1650_p11 }
 0x204   : > { %1207 = dma.done.wait (!%p955_p4), %s752_s14, 256  }
 0x205   : > { %1209 = vsyncadd (!%p955_p4), %s752_s14, 4294967040  ;;  %s761_s30 = scalar_lea.sflag [#allocation10], %s751_s27 }
 0x206   : > { %1211 = dma.done.wait (!%p955_p4), %s761_s30, 256  }
 0x207   : > { %1213 = vsyncadd (!%p955_p4), %s761_s30, 4294967040  ;;  %s25_s20 = sadd.s32 1, %s1236_s20   ;;  %s1652_s15 = smov %s1220_s16 }
 0x208   : > { %p22_p13 = scmp.ge.s32.totalorder %s25_s20, 4   ;;  %s1653_s16 = smov %s1224_s17 }
 0x209   : > { %s1654_s17 = smov %s1421_s22  ;;  %s1655_s18 = smov %s1232_s19 }
 0x20a   : > { %s1656_s19 = smov %s1658_s5  ;;  %24 = sbr.rel (!%p22_p13) target bundleno = 9 (0x9), region = 102 }
 0x211   :  { %766 = vsyncpa [#allocation3], 1 }
 0x212   :  { %768 = vsyncpa [#allocation3 + $0x1], 1 }
 0x213   :  { %769 = vsyncpa [#allocation6], 1 }
 0x214   :  { %770 = vsyncpa [#allocation4], 1 }
 0x215   :  { %772 = vsyncpa [#allocation4 + $0x1], 1 }
 0x216   :  { %773 = vsyncpa [#allocation10], 1 }
 0x217   :  { %775 = vsyncpa [#allocation10 + $0x1], 1 }

</bundles_post_ra>
